<compile_context>
chip_gen: v7x
topology: tpu7x:2x2x1
jax: 0.10.0
libtpu: 0.0.40
codegen_flags: <defaults>
</compile_context>

<pallas_src>
import functools

import jax
import jax.numpy as jnp
from jax.experimental import pallas as pl
from jax.experimental.pallas import tpu as pltpu

_CHUNK = 512  # lanes per in-kernel sub-chunk (multiple of 128)


def _round_up(n, m):
    return ((n + m - 1) // m) * m


def _tensorcores_per_chip():
    """Best-effort TensorCore count per chip (2 on v7x, 1 on v5e/v6e)."""
    try:
        dev = jax.devices()[0]
    except Exception:
        return 1
    for attr in ("num_cores", "core_count"):
        v = getattr(dev, attr, None)
        if isinstance(v, int) and v >= 1:
            return max(1, min(v, 4))
    kind = str(getattr(dev, "device_kind", "")).lower()
    return 2 if "v7" in kind else 1


def _fit_chunk(bm_eff):
    """Round bm_eff to a whole number of inner chunks; return (bm_eff, chunk)."""
    if bm_eff >= _CHUNK:
        return _round_up(bm_eff, _CHUNK), _CHUNK
    return bm_eff, bm_eff  # bm_eff is already a multiple of 128


def _choose_tiling(B, bm, n_cores):
    b_pad_min = _round_up(B, 128)
    bm_eff = min(max(128, _round_up(bm, 128)), b_pad_min)
    bm_eff, chunk = _fit_chunk(bm_eff)
    if n_cores > 1:
        # v7x megacore: prefer a tile count that is a multiple of the core
        # count so both TensorCores get balanced work (tiles stay >= 128).
        n_tiles = -(-b_pad_min // bm_eff)
        if n_tiles % n_cores != 0:
            target = _round_up(n_tiles, n_cores)
            bm_new = max(128, _round_up(-(-b_pad_min // target), 128))
            if bm_new < bm_eff:
                bm_eff, chunk = _fit_chunk(bm_new)
    b_pad = _round_up(B, bm_eff)
    return bm_eff, chunk, b_pad


def _mlp_kernel(x_ref,
                w0_ref, b0_ref,     # Linear(3, 32)
                w1_ref, b1_ref,     # Linear(32, 32)
                w2_ref, b2_ref,     # Conv1d #1 flattened -> Linear(32, 32)
                w3_ref, b3_ref,     # Conv1d #2 flattened -> Linear(32, 32)
                w4_ref, b4_ref,     # Conv1d #3 flattened -> Linear(32, 32)
                w5_ref,             # Linear(32, 1) weight, (1, 32) bf16
                b5_ref,             # Linear(32, 1) bias, scalar in SMEM
                o_ref,
                *, chunk):
    # Batch-in-lanes layout: every activation is (features, chunk), chunk a
    # multiple of 128, so vector ops and the output store are lane-dense.
    # Weights (bf16) and biases (f32) are tiny; hoist them out of the loop.
    w0 = w0_ref[...]; b0 = b0_ref[...]
    w1 = w1_ref[...]; b1 = b1_ref[...]
    w2 = w2_ref[...]; b2 = b2_ref[...]
    w3 = w3_ref[...]; b3 = b3_ref[...]
    w4 = w4_ref[...]; b4 = b4_ref[...]
    w5 = w5_ref[...]
    b5 = b5_ref[0]

    def dense_relu(h, w, b):
        # bf16 MXU operands, f32 accumulation, bias+ReLU in f32, carry bf16.
        y = jnp.dot(w, h, preferred_element_type=jnp.float32)
        return jnp.maximum(y + b, 0.0).astype(jnp.bfloat16)

    n_chunks = x_ref.shape[1] // chunk

    # Sequential inner loop over lane sub-chunks: amortizes the per-grid-step
    # overhead of a large block while bounding the live-activation vregs.
    @pl.loop(0, n_chunks)
    def _(c):
        s = pl.multiple_of(c * chunk, chunk)
        h = x_ref[:, pl.ds(s, chunk)]        # (3, chunk) bf16, batch in lanes
        h = dense_relu(h, w0, b0)            # Linear(3,32)  + ReLU
        h = dense_relu(h, w1, b1)            # Linear(32,32) + ReLU (Dropout p=0: no-op)
        h = dense_relu(h, w2, b2)            # Conv1d #1 as 32x32 matmul + ReLU
        h = dense_relu(h, w3, b3)            # Conv1d #2 as 32x32 matmul + ReLU
        h = dense_relu(h, w4, b4)            # Conv1d #3 as 32x32 matmul + ReLU
        z = jnp.dot(w5, h, preferred_element_type=jnp.float32) + b5   # (1, chunk)
        # Sigmoid: exp and the approximate reciprocal both land on the EUP.
        o_ref[:, pl.ds(s, chunk)] = pl.reciprocal(
            1.0 + jnp.exp(-z), approx=True).astype(o_ref.dtype)


@functools.partial(jax.jit, static_argnames=("bm",))
def _forward(x, torch_params, *, bm):
    B = x.shape[0]
    (w0, b0), (w1, b1), (wc1, bc1), (wc2, bc2), (wc3, bc3), (w5, b5) = torch_params

    # ---- pack weights for the (features, batch) kernel layout (bf16 MXU) ----
    def lin(w, b):
        return (jnp.asarray(w, jnp.float32).astype(jnp.bfloat16),
                jnp.asarray(b, jnp.float32).reshape(-1, 1))

    def conv_as_lin(w, b):   # (oc, ic, k) -> (oc, ic*k); flat idx ic*2+k == view(-1,16,2)
        w = jnp.asarray(w, jnp.float32)
        return (w.reshape(w.shape[0], -1).astype(jnp.bfloat16),
                jnp.asarray(b, jnp.float32).reshape(-1, 1))

    w0, b0 = lin(w0, b0)
    w1, b1 = lin(w1, b1)
    wc1, bc1 = conv_as_lin(wc1, bc1)
    wc2, bc2 = conv_as_lin(wc2, bc2)
    wc3, bc3 = conv_as_lin(wc3, bc3)
    w5 = jnp.asarray(w5, jnp.float32).astype(jnp.bfloat16)   # (1, 32)
    b5 = jnp.asarray(b5, jnp.float32).reshape(1)              # scalar bias -> SMEM

    # ---- batch tiling (generation-aware megacore split) ----------------------
    bm_eff, chunk, B_pad = _choose_tiling(B, bm, _tensorcores_per_chip())
    grid = (B_pad // bm_eff,)

    # Batch-in-lanes input (3, B_pad), bf16, zero-padded tail.  Built inside
    # the same jit as the pallas_call so the transpose/pad fuses with it.
    x_t = jnp.zeros((3, B_pad), jnp.bfloat16).at[:, :B].set(
        x.astype(jnp.bfloat16).T)

    def vmem_full(shape):
        return pl.BlockSpec(shape, lambda i, _n=len(shape): (0,) * _n)

    in_specs = [
        pl.BlockSpec((3, bm_eff), lambda i: (0, i)),        # x (batch in lanes)
        vmem_full(w0.shape), vmem_full(b0.shape),
        vmem_full(w1.shape), vmem_full(b1.shape),
        vmem_full(wc1.shape), vmem_full(bc1.shape),
        vmem_full(wc2.shape), vmem_full(bc2.shape),
        vmem_full(wc3.shape), vmem_full(bc3.shape),
        vmem_full(w5.shape),
        pl.BlockSpec(memory_space=pltpu.MemorySpace.SMEM),   # scalar final bias
    ]

    out = pl.pallas_call(
        functools.partial(_mlp_kernel, chunk=chunk),
        out_shape=jax.ShapeDtypeStruct((1, B_pad), jnp.float32),
        grid=grid,
        in_specs=in_specs,
        out_specs=pl.BlockSpec((1, bm_eff), lambda i: (0, i)),   # lane-dense store
        compiler_params=pltpu.CompilerParams(dimension_semantics=("parallel",)),
    )(x_t, w0, b0, w1, b1, wc1, bc1, wc2, bc2, wc3, bc3, w5, b5)

    return out[0, :B].reshape(B, 1).astype(x.dtype)


def actual_custom_model_pallas(x, torch_params, *, bm=4096):
    """x: (B, 3) float32.

    torch_params: list of 6 (W, b) pairs in torch-native shapes:
      Linear (out,in)/(out,), Conv1d (out, in_ch, k)/(out,).
    Returns (B, 1) float32 matching ActualCustomModel.forward.
    """
    return _forward(x, tuple(tuple(p) for p in torch_params), bm=bm)


def init_params(key):
    """Deterministic synthetic parameters in torch-native shapes."""
    keys = jax.random.split(key, 12)

    def unif(k, shape, fan_in):
        bound = 1.0 / jnp.sqrt(float(fan_in))
        return jax.random.uniform(k, shape, jnp.float32, -bound, bound)

    return [
        (unif(keys[0], (32, 3), 3),       unif(keys[1], (32,), 3)),    # Linear(3,32)
        (unif(keys[2], (32, 32), 32),     unif(keys[3], (32,), 32)),   # Linear(32,32)
        (unif(keys[4], (32, 16, 2), 32),  unif(keys[5], (32,), 32)),   # Conv1d
        (unif(keys[6], (32, 16, 2), 32),  unif(keys[7], (32,), 32)),   # Conv1d
        (unif(keys[8], (32, 16, 2), 32),  unif(keys[9], (32,), 32)),   # Conv1d
        (unif(keys[10], (1, 32), 32),     unif(keys[11], (1,), 32)),   # Linear(32,1)
    ]


def reference_forward(x, torch_params):
    """Pure-JAX f32 reference of ActualCustomModel.forward on torch-native params."""
    (w0, b0), (w1, b1), (wc1, bc1), (wc2, bc2), (wc3, bc3), (w5, b5) = torch_params
    h = jax.nn.relu(x @ w0.T + b0)
    h = jax.nn.relu(h @ w1.T + b1)
    for wc, bc in ((wc1, bc1), (wc2, bc2), (wc3, bc3)):
        h = jax.nn.relu(h @ wc.reshape(wc.shape[0], -1).T + bc)
    return jax.nn.sigmoid(h @ w5.T + b5)


if __name__ == "__main__":
    key = jax.random.PRNGKey(0)
    k_x, k_p = jax.random.split(key)

    B = 16
    x = jax.random.normal(k_x, (B, 3), dtype=jnp.float32)
    params = init_params(k_p)

    out = actual_custom_model_pallas(x, params)
    out = jax.block_until_ready(out)

    ref = reference_forward(x, params)
    assert out.shape == (B, 1)
    # Tolerance covers bf16 MXU operands (f32 accumulation) and the EUP
    # approximate reciprocal in the sigmoid epilogue.
    err = float(jnp.max(jnp.abs(out - ref)))
    assert err < 2e-2, f"max abs error {err}"

    print("KERNEL_OK")
</pallas_src>

<mosaic_0001>
module attributes {stable_mosaic.version = 11 : i64} {
  func.func @_mlp_kernel(%arg0: i32, %arg1: memref<3x128xbf16, #tpu.memory_space<vmem>>, %arg2: memref<32x3xbf16, #tpu.memory_space<vmem>>, %arg3: memref<32x1xf32, #tpu.memory_space<vmem>>, %arg4: memref<32x32xbf16, #tpu.memory_space<vmem>>, %arg5: memref<32x1xf32, #tpu.memory_space<vmem>>, %arg6: memref<32x32xbf16, #tpu.memory_space<vmem>>, %arg7: memref<32x1xf32, #tpu.memory_space<vmem>>, %arg8: memref<32x32xbf16, #tpu.memory_space<vmem>>, %arg9: memref<32x1xf32, #tpu.memory_space<vmem>>, %arg10: memref<32x32xbf16, #tpu.memory_space<vmem>>, %arg11: memref<32x1xf32, #tpu.memory_space<vmem>>, %arg12: memref<1x32xbf16, #tpu.memory_space<vmem>>, %arg13: memref<1xf32, #tpu.memory_space<smem>>, %arg14: memref<1x128xf32, #tpu.memory_space<vmem>>) attributes {dimension_semantics = [#tpu.dimension_semantics<parallel>], iteration_bounds = array<i64: 1>, scalar_prefetch = 0 : i64, scratch_operands = 0 : i64, tpu.core_type = #tpu.core_type<tc>, window_params = [{transform_indices = @transform_0, window_bounds = array<i64: 3, 128>}, {pipeline_mode = #tpu.pipeline_mode<synchronous>, transform_indices = @transform_1, window_bounds = array<i64: 32, 3>}, {pipeline_mode = #tpu.pipeline_mode<synchronous>, transform_indices = @transform_2, window_bounds = array<i64: 32, 1>}, {pipeline_mode = #tpu.pipeline_mode<synchronous>, transform_indices = @transform_3, window_bounds = array<i64: 32, 32>}, {pipeline_mode = #tpu.pipeline_mode<synchronous>, transform_indices = @transform_4, window_bounds = array<i64: 32, 1>}, {pipeline_mode = #tpu.pipeline_mode<synchronous>, transform_indices = @transform_5, window_bounds = array<i64: 32, 32>}, {pipeline_mode = #tpu.pipeline_mode<synchronous>, transform_indices = @transform_6, window_bounds = array<i64: 32, 1>}, {pipeline_mode = #tpu.pipeline_mode<synchronous>, transform_indices = @transform_7, window_bounds = array<i64: 32, 32>}, {pipeline_mode = #tpu.pipeline_mode<synchronous>, transform_indices = @transform_8, window_bounds = array<i64: 32, 1>}, {pipeline_mode = #tpu.pipeline_mode<synchronous>, transform_indices = @transform_9, window_bounds = array<i64: 32, 32>}, {pipeline_mode = #tpu.pipeline_mode<synchronous>, transform_indices = @transform_10, window_bounds = array<i64: 32, 1>}, {pipeline_mode = #tpu.pipeline_mode<synchronous>, transform_indices = @transform_11, window_bounds = array<i64: 1, 32>}, {transform_indices = @transform_12, window_bounds = array<i64: 1>}, {transform_indices = @transform_13, window_bounds = array<i64: 1, 128>}]} {
    %c0 = arith.constant 0 : index
    %c0_0 = arith.constant 0 : index
    %0 = vector.load %arg2[%c0, %c0_0] : memref<32x3xbf16, #tpu.memory_space<vmem>>, vector<32x3xbf16>
    %c0_1 = arith.constant 0 : index
    %c0_2 = arith.constant 0 : index
    %1 = vector.load %arg3[%c0_1, %c0_2] : memref<32x1xf32, #tpu.memory_space<vmem>>, vector<32x1xf32>
    %c0_3 = arith.constant 0 : index
    %c0_4 = arith.constant 0 : index
    %2 = vector.load %arg4[%c0_3, %c0_4] : memref<32x32xbf16, #tpu.memory_space<vmem>>, vector<32x32xbf16>
    %c0_5 = arith.constant 0 : index
    %c0_6 = arith.constant 0 : index
    %3 = vector.load %arg5[%c0_5, %c0_6] : memref<32x1xf32, #tpu.memory_space<vmem>>, vector<32x1xf32>
    %c0_7 = arith.constant 0 : index
    %c0_8 = arith.constant 0 : index
    %4 = vector.load %arg6[%c0_7, %c0_8] : memref<32x32xbf16, #tpu.memory_space<vmem>>, vector<32x32xbf16>
    %c0_9 = arith.constant 0 : index
    %c0_10 = arith.constant 0 : index
    %5 = vector.load %arg7[%c0_9, %c0_10] : memref<32x1xf32, #tpu.memory_space<vmem>>, vector<32x1xf32>
    %c0_11 = arith.constant 0 : index
    %c0_12 = arith.constant 0 : index
    %6 = vector.load %arg8[%c0_11, %c0_12] : memref<32x32xbf16, #tpu.memory_space<vmem>>, vector<32x32xbf16>
    %c0_13 = arith.constant 0 : index
    %c0_14 = arith.constant 0 : index
    %7 = vector.load %arg9[%c0_13, %c0_14] : memref<32x1xf32, #tpu.memory_space<vmem>>, vector<32x1xf32>
    %c0_15 = arith.constant 0 : index
    %c0_16 = arith.constant 0 : index
    %8 = vector.load %arg10[%c0_15, %c0_16] : memref<32x32xbf16, #tpu.memory_space<vmem>>, vector<32x32xbf16>
    %c0_17 = arith.constant 0 : index
    %c0_18 = arith.constant 0 : index
    %9 = vector.load %arg11[%c0_17, %c0_18] : memref<32x1xf32, #tpu.memory_space<vmem>>, vector<32x1xf32>
    %c0_19 = arith.constant 0 : index
    %c0_20 = arith.constant 0 : index
    %10 = vector.load %arg12[%c0_19, %c0_20] : memref<1x32xbf16, #tpu.memory_space<vmem>>, vector<1x32xbf16>
    %c0_21 = arith.constant 0 : index
    %11 = memref.load %arg13[%c0_21] : memref<1xf32, #tpu.memory_space<smem>>
    %c0_i32 = arith.constant 0 : i32
    %c1_i32 = arith.constant 1 : i32
    %12 = arith.muli %c0_i32, %c1_i32 : i32
    %c0_i32_22 = arith.constant 0 : i32
    %13 = arith.addi %c0_i32_22, %12 : i32
    %c128_i32 = arith.constant 128 : i32
    %14 = arith.muli %13, %c128_i32 : i32
    %15 = tpu.assume_multiple %14, 128 : i32
    %c0_23 = arith.constant 0 : index
    %16 = arith.index_cast %15 : i32 to index
    %17 = vector.load %arg1[%c0_23, %16] : memref<3x128xbf16, #tpu.memory_space<vmem>>, vector<3x128xbf16>
    %cst = arith.constant dense<0.000000e+00> : vector<32x128xf32>
    %18 = tpu.matmul %0, %17, %cst {dimension_numbers = #tpu.dot_dimension_numbers<[1], [0], [0], [1], [0, 0, 1, 1], [], []>} : vector<32x3xbf16>, vector<3x128xbf16>, vector<32x128xf32> -> vector<32x128xf32>
    %19 = vector.broadcast %1 : vector<32x1xf32> to vector<32x128xf32>
    %20 = arith.addf %18, %19 : vector<32x128xf32>
    %cst_24 = arith.constant 0.000000e+00 : f32
    %21 = vector.broadcast %cst_24 : f32 to vector<32x128xf32>
    %22 = arith.maximumf %20, %21 : vector<32x128xf32>
    %23 = arith.truncf %22 : vector<32x128xf32> to vector<32x128xbf16>
    %cst_25 = arith.constant dense<0.000000e+00> : vector<32x128xf32>
    %24 = tpu.matmul %2, %23, %cst_25 {dimension_numbers = #tpu.dot_dimension_numbers<[1], [0], [0], [1], [0, 0, 1, 1], [], []>} : vector<32x32xbf16>, vector<32x128xbf16>, vector<32x128xf32> -> vector<32x128xf32>
    %25 = vector.broadcast %3 : vector<32x1xf32> to vector<32x128xf32>
    %26 = arith.addf %24, %25 : vector<32x128xf32>
    %cst_26 = arith.constant 0.000000e+00 : f32
    %27 = vector.broadcast %cst_26 : f32 to vector<32x128xf32>
    %28 = arith.maximumf %26, %27 : vector<32x128xf32>
    %29 = arith.truncf %28 : vector<32x128xf32> to vector<32x128xbf16>
    %cst_27 = arith.constant dense<0.000000e+00> : vector<32x128xf32>
    %30 = tpu.matmul %4, %29, %cst_27 {dimension_numbers = #tpu.dot_dimension_numbers<[1], [0], [0], [1], [0, 0, 1, 1], [], []>} : vector<32x32xbf16>, vector<32x128xbf16>, vector<32x128xf32> -> vector<32x128xf32>
    %31 = vector.broadcast %5 : vector<32x1xf32> to vector<32x128xf32>
    %32 = arith.addf %30, %31 : vector<32x128xf32>
    %cst_28 = arith.constant 0.000000e+00 : f32
    %33 = vector.broadcast %cst_28 : f32 to vector<32x128xf32>
    %34 = arith.maximumf %32, %33 : vector<32x128xf32>
    %35 = arith.truncf %34 : vector<32x128xf32> to vector<32x128xbf16>
    %cst_29 = arith.constant dense<0.000000e+00> : vector<32x128xf32>
    %36 = tpu.matmul %6, %35, %cst_29 {dimension_numbers = #tpu.dot_dimension_numbers<[1], [0], [0], [1], [0, 0, 1, 1], [], []>} : vector<32x32xbf16>, vector<32x128xbf16>, vector<32x128xf32> -> vector<32x128xf32>
    %37 = vector.broadcast %7 : vector<32x1xf32> to vector<32x128xf32>
    %38 = arith.addf %36, %37 : vector<32x128xf32>
    %cst_30 = arith.constant 0.000000e+00 : f32
    %39 = vector.broadcast %cst_30 : f32 to vector<32x128xf32>
    %40 = arith.maximumf %38, %39 : vector<32x128xf32>
    %41 = arith.truncf %40 : vector<32x128xf32> to vector<32x128xbf16>
    %cst_31 = arith.constant dense<0.000000e+00> : vector<32x128xf32>
    %42 = tpu.matmul %8, %41, %cst_31 {dimension_numbers = #tpu.dot_dimension_numbers<[1], [0], [0], [1], [0, 0, 1, 1], [], []>} : vector<32x32xbf16>, vector<32x128xbf16>, vector<32x128xf32> -> vector<32x128xf32>
    %43 = vector.broadcast %9 : vector<32x1xf32> to vector<32x128xf32>
    %44 = arith.addf %42, %43 : vector<32x128xf32>
    %cst_32 = arith.constant 0.000000e+00 : f32
    %45 = vector.broadcast %cst_32 : f32 to vector<32x128xf32>
    %46 = arith.maximumf %44, %45 : vector<32x128xf32>
    %47 = arith.truncf %46 : vector<32x128xf32> to vector<32x128xbf16>
    %cst_33 = arith.constant dense<0.000000e+00> : vector<1x128xf32>
    %48 = tpu.matmul %10, %47, %cst_33 {dimension_numbers = #tpu.dot_dimension_numbers<[1], [0], [0], [1], [0, 0, 1, 1], [], []>} : vector<1x32xbf16>, vector<32x128xbf16>, vector<1x128xf32> -> vector<1x128xf32>
    %49 = vector.broadcast %11 : f32 to vector<1x128xf32>
    %50 = arith.addf %48, %49 : vector<1x128xf32>
    %cst_34 = arith.constant 0.000000e+00 : f32
    %51 = vector.broadcast %cst_34 : f32 to vector<1x128xf32>
    %52 = arith.subf %51, %50 : vector<1x128xf32>
    %53 = math.exp %52 : vector<1x128xf32>
    %cst_35 = arith.constant 1.000000e+00 : f32
    %54 = vector.broadcast %cst_35 : f32 to vector<1x128xf32>
    %55 = arith.addf %54, %53 : vector<1x128xf32>
    %56 = tpu.reciprocal %55 {approx = true} : vector<1x128xf32> -> vector<1x128xf32>
    %c0_36 = arith.constant 0 : index
    %57 = arith.index_cast %15 : i32 to index
    %58 = vector.load %arg14[%c0_36, %57] : memref<1x128xf32, #tpu.memory_space<vmem>>, vector<1x128xf32>
    tpu.vector_store %arg14[%c0_36, %57], %56 {strides = array<i32>} : memref<1x128xf32, #tpu.memory_space<vmem>>, vector<1x128xf32>,
    %c1_i32_37 = arith.constant 1 : i32
    return
  }
  func.func @transform_0(%arg0: i32) -> (i32, i32) {
    %c0_i32 = arith.constant 0 : i32
    %c0_i32_0 = arith.constant 0 : i32
    return %c0_i32, %arg0 : i32, i32
  }
  func.func @transform_1(%arg0: i32) -> (i32, i32) {
    %c0_i32 = arith.constant 0 : i32
    %c0_i32_0 = arith.constant 0 : i32
    %c0_i32_1 = arith.constant 0 : i32
    return %c0_i32, %c0_i32_0 : i32, i32
  }
  func.func @transform_2(%arg0: i32) -> (i32, i32) {
    %c0_i32 = arith.constant 0 : i32
    %c0_i32_0 = arith.constant 0 : i32
    %c0_i32_1 = arith.constant 0 : i32
    return %c0_i32, %c0_i32_0 : i32, i32
  }
  func.func @transform_3(%arg0: i32) -> (i32, i32) {
    %c0_i32 = arith.constant 0 : i32
    %c0_i32_0 = arith.constant 0 : i32
    %c0_i32_1 = arith.constant 0 : i32
    return %c0_i32, %c0_i32_0 : i32, i32
  }
  func.func @transform_4(%arg0: i32) -> (i32, i32) {
    %c0_i32 = arith.constant 0 : i32
    %c0_i32_0 = arith.constant 0 : i32
    %c0_i32_1 = arith.constant 0 : i32
    return %c0_i32, %c0_i32_0 : i32, i32
  }
  func.func @transform_5(%arg0: i32) -> (i32, i32) {
    %c0_i32 = arith.constant 0 : i32
    %c0_i32_0 = arith.constant 0 : i32
    %c0_i32_1 = arith.constant 0 : i32
    return %c0_i32, %c0_i32_0 : i32, i32
  }
  func.func @transform_6(%arg0: i32) -> (i32, i32) {
    %c0_i32 = arith.constant 0 : i32
    %c0_i32_0 = arith.constant 0 : i32
    %c0_i32_1 = arith.constant 0 : i32
    return %c0_i32, %c0_i32_0 : i32, i32
  }
  func.func @transform_7(%arg0: i32) -> (i32, i32) {
    %c0_i32 = arith.constant 0 : i32
    %c0_i32_0 = arith.constant 0 : i32
    %c0_i32_1 = arith.constant 0 : i32
    return %c0_i32, %c0_i32_0 : i32, i32
  }
  func.func @transform_8(%arg0: i32) -> (i32, i32) {
    %c0_i32 = arith.constant 0 : i32
    %c0_i32_0 = arith.constant 0 : i32
    %c0_i32_1 = arith.constant 0 : i32
    return %c0_i32, %c0_i32_0 : i32, i32
  }
  func.func @transform_9(%arg0: i32) -> (i32, i32) {
    %c0_i32 = arith.constant 0 : i32
    %c0_i32_0 = arith.constant 0 : i32
    %c0_i32_1 = arith.constant 0 : i32
    return %c0_i32, %c0_i32_0 : i32, i32
  }
  func.func @transform_10(%arg0: i32) -> (i32, i32) {
    %c0_i32 = arith.constant 0 : i32
    %c0_i32_0 = arith.constant 0 : i32
    %c0_i32_1 = arith.constant 0 : i32
    return %c0_i32, %c0_i32_0 : i32, i32
  }
  func.func @transform_11(%arg0: i32) -> (i32, i32) {
    %c0_i32 = arith.constant 0 : i32
    %c0_i32_0 = arith.constant 0 : i32
    %c0_i32_1 = arith.constant 0 : i32
    return %c0_i32, %c0_i32_0 : i32, i32
  }
  func.func @transform_12(%arg0: i32) -> i32 {
    %c0_i32 = arith.constant 0 : i32
    %c0_i32_0 = arith.constant 0 : i32
    return %c0_i32 : i32
  }
  func.func @transform_13(%arg0: i32) -> (i32, i32) {
    %c0_i32 = arith.constant 0 : i32
    %c0_i32_0 = arith.constant 0 : i32
    return %c0_i32, %arg0 : i32, i32
  }
}

</mosaic_0001>

<bundles_post_ra>
// kernel: _forward.1
= control target key start
LH: loop header
LB: loop body
LE: loop exit
PB: predicated region body
PF: predicated region fallthrough
CT: control target
= control target key end

     0   :  { %vm126_vm0 = vcmask 1040384   ;;  %vm127_vm1 = vcmask 1041408   ;;  %vm119_vm2 = vcmask 23552   ;;  %v716_v1 = vmov 65535   ;;  %s903_s0 = inlined_call_operand.vmem [shape: bf16[3,128], index: 0, kind: input, shape index: {}]   ;;  %s904_s1 = inlined_call_operand.vmem [shape: bf16[32,3], index: 1, kind: input, shape index: {}]   ;;  %s905_s2 = inlined_call_operand.vmem [shape: f32[32,1], index: 2, kind: input, shape index: {}]   ;;  %s906_s4 = inlined_call_operand.vmem [shape: f32[32,1], index: 4, kind: input, shape index: {}]   ;;  %s907_s6 = inlined_call_operand.vmem [shape: f32[32,1], index: 6, kind: input, shape index: {}]   ;;  %s908_s8 = inlined_call_operand.vmem [shape: f32[32,1], index: 8, kind: input, shape index: {}]   ;;  %s909_s10 = inlined_call_operand.vmem [shape: f32[32,1], index: 10, kind: input, shape index: {}]   ;;  %s910_s3 = inlined_call_operand.vmem [shape: bf16[32,32], index: 3, kind: input, shape index: {}]   ;;  %s911_s5 = inlined_call_operand.vmem [shape: bf16[32,32], index: 5, kind: input, shape index: {}]   ;;  %s912_s7 = inlined_call_operand.vmem [shape: bf16[32,32], index: 7, kind: input, shape index: {}]   ;;  %s913_s9 = inlined_call_operand.vmem [shape: bf16[32,32], index: 9, kind: input, shape index: {}]   ;;  %s914_s11 = inlined_call_operand.vmem [shape: bf16[1,32], index: 11, kind: input, shape index: {}]   ;;  %s915_s12 = inlined_call_operand.<no memory space> [shape: f32[1], index: 12, kind: input, shape index: {}]   ;;  %s916_s13 = inlined_call_operand.vmem [shape: f32[1,128], index: 13, kind: output, shape index: {}]  }
   0x1   :  { %v88_v0 = vld [vmem:[%s903_s0] sm:$0x3]  ;;  %v128_v2 = vsel %vm126_vm0, 4294967295, %v716_v1  ;;  %v52_v7 = vld [vmem:[%s905_s2 + $0x10] sm:$0xff]  ;;  %v717_v8 = vmov 0   ;;  %v703_v9 = vld [vmem:[%s904_s1 + $0x8] sm:$0xff]  }
   0x2   :  { %v702_v3 = vld [vmem:[%s904_s1] sm:$0xff]   ;;  %v129_v4 = vsel %vm127_vm1, %v128_v2, 0  ;;  %700 = vset.pattern.permute.xlu0 %v717_v8  ;;  %701 = vset.pattern.permute.xlu1 %v717_v8  ;;  %v51_v10 = vld [vmem:[%s905_s2 + $0x8] sm:$0xff]  ;;  %v53_v11 = vld [vmem:[%s905_s2 + $0x18] sm:$0xff]  ;;  %vm218_vm3 = vcmask 261120   ;;  %vm719_vm4 = vmmov 0  }
   0x3   :  { %v131_v5 = vand.u32 %v129_v4, %v88_v0  ;;  %652 = vmatprep.mubr.msk.bf16.mxu0 %vm119_vm2, %v702_v3  ;;  %v50_v6 = vld [vmem:[%s905_s2] sm:$0xff]  ;;  %101 = vperm.xlu1 %701, %v52_v7   ;;  %v59_v13 = vld [vmem:[%s906_s4 + $0x8] sm:$0xff]  ;;  %v60_v14 = vld [vmem:[%s906_s4 + $0x10] sm:$0xff] }
   0x4   :  { %91 = vperm.xlu0 %700, %v50_v6   ;;  %v58_v12 = vld [vmem:[%s906_s4] sm:$0xff]  ;;  %v61_v15 = vld [vmem:[%s906_s4 + $0x18] sm:$0xff]  ;;  %v67_v17 = vld [vmem:[%s907_s6 + $0x8] sm:$0xff] }
   0x5   :  { %650 = vmatprep.subr.bf16.mxu0 %v131_v5  ;;  %v66_v16 = vld [vmem:[%s907_s6] sm:$0xff]  ;;  %v68_v18 = vld [vmem:[%s907_s6 + $0x10] sm:$0xff]  ;;  %v69_v19 = vld [vmem:[%s907_s6 + $0x18] sm:$0xff] }
   0x6   :  { %651 = vmatpush3.bf16.msra.mxu0 %v131_v5  ;;  %v74_v20 = vld [vmem:[%s908_s8] sm:$0xff]  ;;  %v75_v21 = vld [vmem:[%s908_s8 + $0x8] sm:$0xff]  ;;  %v76_v22 = vld [vmem:[%s908_s8 + $0x10] sm:$0xff] }
   0x7   :  { %106 = vperm.xlu1 %701, %v53_v11   ;;  %v77_v23 = vld [vmem:[%s908_s8 + $0x18] sm:$0xff]  ;;  %v82_v24 = vld [vmem:[%s909_s10] sm:$0xff]  ;;  %v83_v25 = vld [vmem:[%s909_s10 + $0x8] sm:$0xff] }
   0x8   :  { %96 = vperm.xlu0 %700, %v51_v10   ;;  %v84_v26 = vld [vmem:[%s909_s10 + $0x10] sm:$0xff]  ;;  %v85_v27 = vld [vmem:[%s909_s10 + $0x18] sm:$0xff]  ;;  %v704_v28 = vld [vmem:[%s910_s3] sm:$0xff]  }
   0x9   :  { %653 = vmatmul.mubr.msk.bf16.vlgmr.msra.gmra.mrb[0].mxu0 %vm119_vm2, %v703_v9  ;;  %660 = vmatprep.mubr.msk.bf16.mxu1 %vm218_vm3, %v704_v28  ;;  %v705_v47 = vld [vmem:[%s910_s3 + $0x8] sm:$0xff]   ;;  %v706_v48 = vld [vmem:[%s911_s5] sm:$0xff]  }
   0xa   :  { %668 = vmatprep.mubr.msk.bf16.mxu0 %vm218_vm3, %v706_v48  ;;  %v707_v3 = vld [vmem:[%s911_s5 + $0x8] sm:$0xff]   ;;  %v708_v4 = vld [vmem:[%s912_s7] sm:$0xff]  }
   0xb   :  { %195 = vperm.xlu1 %701, %v59_v13  }
   0xc   :  { %190 = vperm.xlu0 %700, %v58_v12  }
   0xf   :  { %205 = vperm.xlu1 %701, %v61_v15  }
  0x10   :  { %200 = vperm.xlu0 %700, %v60_v14  }
  0x13   :  { %287 = vperm.xlu1 %701, %v67_v17  }
  0x14   :  { %282 = vperm.xlu0 %700, %v66_v16  }
  0x17   :  { %297 = vperm.xlu1 %701, %v69_v19  }
  0x18   :  { %292 = vperm.xlu0 %700, %v68_v18  }
  0x1b   :  { %378 = vperm.xlu1 %701, %v75_v21  }
  0x1c   :  { %373 = vperm.xlu0 %700, %v74_v20  }
  0x1f   :  { %388 = vperm.xlu1 %701, %v77_v23   ;;  %v709_v23 = vld [vmem:[%s912_s7 + $0x8] sm:$0xff]  }
  0x20   :  { %383 = vperm.xlu0 %700, %v76_v22  }
  0x23   :  { %469 = vperm.xlu1 %701, %v83_v25  }
  0x24   :  { %464 = vperm.xlu0 %700, %v82_v24   ;;  %v710_v24 = vld [vmem:[%s913_s9] sm:$0xff]  }
  0x27   :  { %479 = vperm.xlu1 %701, %v85_v27  }
  0x28   :  { %474 = vperm.xlu0 %700, %v84_v26  }
  0x82   :  { %v102_v29 = vpop.permute.xlu1 %101 }
  0x83   :  { %v92_v30 = vpop.permute.xlu0 %91 }
  0x86   :  { %v107_v34 = vpop.permute.xlu1 %106 }
  0x87   :  { %v97_v37 = vpop.permute.xlu0 %96 }
  0x8a   :  { %v196_v50 = vpop.permute.xlu1 %195 }
  0x8b   :  { %v191_v49 = vpop.permute.xlu0 %190 }
  0x8e   :  { %v206_v55 = vpop.permute.xlu1 %205 }
  0x8f   :  { %v201_v51 = vpop.permute.xlu0 %200 }
  0x92   :  { %v288_v6 = vpop.permute.xlu1 %287 }
  0x93   :  { %v283_v5 = vpop.permute.xlu0 %282 }
  0x96   :  { %v298_v11 = vpop.permute.xlu1 %297 }
  0x97   :  { %v293_v7 = vpop.permute.xlu0 %292 }
  0x9a   :  { %v379_v26 = vpop.permute.xlu1 %378 }
  0x9b   :  { %v374_v25 = vpop.permute.xlu0 %373 }
  0x9f   :  { %v384_v27 = vpop.permute.xlu0 %383 }
  0xdc   :  { %v654_v31 = vpop.f32.mrb[0].mxu0 }
  0xdd   :  { %v176_v32 = vadd.f32 %v654_v31, %v102_v29  ;;  %v167_v33 = vpop.f32.mrb[1].mxu0  ;;  %v389_v31 = vpop.permute.xlu1 %388 }
  0xde   :  { %v168_v35 = vadd.f32 %v167_v33, %v92_v30  ;;  %v655_v36 = vpop.f32.mrb[2].mxu0 }
  0xdf   :  { %v179_v38 = vadd.f32 %v655_v36, %v107_v34  ;;  %v170_v39 = vpop.f32.mrb[3].mxu0  ;;  %v184_v41 = vmax.f32 %v176_v32, 0.0 }
  0xe0   :  { %v171_v40 = vadd.f32 %v170_v39, %v97_v37  ;;  %v182_v43 = vmax.f32 %v168_v35, 0.0 }
  0xe1   :  { %v185_v42 = vmax.f32 %v179_v38, 0.0 }
  0xe2   :  { %v183_v44 = vmax.f32 %v171_v40, 0.0 }
  0xe3   :  { %v187_v45 = vpack.c.bf16 %v185_v42, %v184_v41 }
  0xe4   :  { %v186_v46 = vpack.c.bf16 %v183_v44, %v182_v43  ;;  %v711_v43 = vld [vmem:[%s913_s9 + $0x8] sm:$0xff]   ;;  %v718_v44 = vmov 0.0  }
  0xe6   :  { %656 = vmatprep.subr.bf16.mxu1 %v186_v46 }
  0xe7   :  { %657 = vmatpush3.bf16.msra.mxu1 %v186_v46  ;;  %v470_v46 = vpop.permute.xlu1 %469 }
  0xe8   :  { %658 = vmatprep.subr.bf16.mxu1 %v187_v45 }
  0xeb   :  { %659 = vmatpush3.bf16.msra.mxu1 %v187_v45  ;;  %v465_v45 = vpop.permute.xlu0 %464 }
  0xee   :  { %661 = vmatmul.mubr.msk.bf16.vlgmr.msra.gmra.mrb[0].mxu1 %vm218_vm3, %v705_v47 }
  0xef   :  { %676 = vmatprep.mubr.msk.bf16.mxu1 %vm218_vm3, %v708_v4  ;;  %v475_v47 = vpop.permute.xlu0 %474 }
 0x1c1   :  { %v662_v52 = vpop.f32.mrb[0].mxu1 }
 0x1c2   :  { %v268_v53 = vadd.f32 %v662_v52, %v201_v51  ;;  %v259_v54 = vpop.f32.mrb[1].mxu1  ;;  %v480_v51 = vpop.permute.xlu1 %479 }
 0x1c3   :  { %v260_v56 = vadd.f32 %v259_v54, %v191_v49  ;;  %v663_v57 = vpop.f32.mrb[2].mxu1 }
 0x1c4   :  { %v271_v58 = vadd.f32 %v663_v57, %v206_v55  ;;  %v262_v59 = vpop.f32.mrb[3].mxu1  ;;  %v276_v61 = vmax.f32 %v268_v53, 0.0 }
 0x1c5   :  { %v263_v60 = vadd.f32 %v262_v59, %v196_v50  ;;  %v274_v63 = vmax.f32 %v260_v56, 0.0 }
 0x1c6   :  { %v277_v62 = vmax.f32 %v271_v58, 0.0 }
 0x1c7   :  { %v275_v0 = vmax.f32 %v263_v60, 0.0 }
 0x1c8   :  { %v279_v1 = vpack.c.bf16 %v277_v62, %v276_v61 }
 0x1c9   :  { %v278_v2 = vpack.c.bf16 %v275_v0, %v274_v63  ;;  %v86_v63 = vld [vmem:[%s914_s11] sm:$0x1]  ;;  %v553_v0 = vstv %s915_s12 }
 0x1cb   :  { %664 = vmatprep.subr.bf16.mxu0 %v278_v2 }
 0x1cc   :  { %665 = vmatpush3.bf16.msra.mxu0 %v278_v2 }
 0x1cd   :  { %666 = vmatprep.subr.bf16.mxu0 %v279_v1 }
 0x1d0   :  { %667 = vmatpush3.bf16.msra.mxu0 %v279_v1 }
 0x1d3   :  { %669 = vmatmul.mubr.msk.bf16.vlgmr.msra.gmra.mrb[4].mxu0 %vm218_vm3, %v707_v3 }
 0x1d4   :  { %684 = vmatprep.mubr.msk.bf16.mxu0 %vm218_vm3, %v710_v24 }
 0x2a6   :  { %v670_v8 = vpop.f32.mrb[4].mxu0 }
 0x2a7   :  { %v359_v9 = vadd.f32 %v670_v8, %v293_v7  ;;  %v350_v10 = vpop.f32.mrb[5].mxu0 }
 0x2a8   :  { %v351_v12 = vadd.f32 %v350_v10, %v283_v5  ;;  %v671_v13 = vpop.f32.mrb[6].mxu0 }
 0x2a9   :  { %v362_v14 = vadd.f32 %v671_v13, %v298_v11  ;;  %v353_v15 = vpop.f32.mrb[7].mxu0  ;;  %v367_v17 = vmax.f32 %v359_v9, 0.0 }
 0x2aa   :  { %v354_v16 = vadd.f32 %v353_v15, %v288_v6  ;;  %v365_v19 = vmax.f32 %v351_v12, 0.0 }
 0x2ab   :  { %v368_v18 = vmax.f32 %v362_v14, 0.0 }
 0x2ac   :  { %v366_v20 = vmax.f32 %v354_v16, 0.0 }
 0x2ad   :  { %v370_v21 = vpack.c.bf16 %v368_v18, %v367_v17 }
 0x2ae   :  { %v369_v22 = vpack.c.bf16 %v366_v20, %v365_v19 }
 0x2b0   :  { %672 = vmatprep.subr.bf16.mxu1 %v369_v22 }
 0x2b1   :  { %673 = vmatpush3.bf16.msra.mxu1 %v369_v22 }
 0x2b2   :  { %674 = vmatprep.subr.bf16.mxu1 %v370_v21 }
 0x2b5   :  { %675 = vmatpush3.bf16.msra.mxu1 %v370_v21 }
 0x2b6   :  { %688 = vmatprep.subr.bf16.mxu1 %v718_v44 }
 0x2b8   :  { %677 = vmatmul.mubr.msk.bf16.vlgmr.msra.gmra.mrb[4].mxu1 %vm218_vm3, %v709_v23 }
 0x2b9   :  { %692 = vmatprep.mubr.msk.bf16.mxu1 %vm719_vm4, %v718_v44 }
 0x38b   :  { %v678_v28 = vpop.f32.mrb[4].mxu1 }
 0x38c   :  { %v450_v29 = vadd.f32 %v678_v28, %v384_v27  ;;  %v441_v30 = vpop.f32.mrb[5].mxu1 }
 0x38d   :  { %v442_v32 = vadd.f32 %v441_v30, %v374_v25  ;;  %v679_v33 = vpop.f32.mrb[6].mxu1 }
 0x38e   :  { %v453_v34 = vadd.f32 %v679_v33, %v389_v31  ;;  %v444_v35 = vpop.f32.mrb[7].mxu1  ;;  %v458_v37 = vmax.f32 %v450_v29, 0.0 }
 0x38f   :  { %v445_v36 = vadd.f32 %v444_v35, %v379_v26  ;;  %v456_v39 = vmax.f32 %v442_v32, 0.0 }
 0x390   :  { %v459_v38 = vmax.f32 %v453_v34, 0.0 }
 0x391   :  { %v457_v40 = vmax.f32 %v445_v36, 0.0 }
 0x392   :  { %v461_v41 = vpack.c.bf16 %v459_v38, %v458_v37 }
 0x393   :  { %v460_v42 = vpack.c.bf16 %v457_v40, %v456_v39 }
 0x395   :  { %680 = vmatprep.subr.bf16.mxu0 %v460_v42 }
 0x396   :  { %681 = vmatpush3.bf16.msra.mxu0 %v460_v42 }
 0x397   :  { %682 = vmatprep.subr.bf16.mxu0 %v461_v41 }
 0x39a   :  { %683 = vmatpush3.bf16.msra.mxu0 %v461_v41 }
 0x39d   :  { %685 = vmatmul.mubr.msk.bf16.vlgmr.msra.gmra.mrb[8].mxu0 %vm218_vm3, %v711_v43 }
 0x470   :  { %v686_v48 = vpop.f32.mrb[8].mxu0 }
 0x471   :  { %v541_v49 = vadd.f32 %v686_v48, %v475_v47  ;;  %v532_v50 = vpop.f32.mrb[9].mxu0 }
 0x472   :  { %v533_v52 = vadd.f32 %v532_v50, %v465_v45  ;;  %v687_v53 = vpop.f32.mrb[10].mxu0 }
 0x473   :  { %v544_v54 = vadd.f32 %v687_v53, %v480_v51  ;;  %v535_v55 = vpop.f32.mrb[11].mxu0  ;;  %v549_v57 = vmax.f32 %v541_v49, 0.0 }
 0x474   :  { %v536_v56 = vadd.f32 %v535_v55, %v470_v46  ;;  %v547_v59 = vmax.f32 %v533_v52, 0.0 }
 0x475   :  { %v550_v58 = vmax.f32 %v544_v54, 0.0 }
 0x476   :  { %v548_v60 = vmax.f32 %v536_v56, 0.0 }
 0x477   :  { %v552_v61 = vpack.c.bf16 %v550_v58, %v549_v57 }
 0x478   :  { %v551_v62 = vpack.c.bf16 %v548_v60, %v547_v59 }
 0x47a   :  { %689 = vmatpush3.bf16.msra.mxu1 %v551_v62 }
 0x47b   :  { %690 = vmatprep.subr.bf16.mxu1 %v718_v44 }
 0x47e   :  { %691 = vmatpush3.bf16.msra.mxu1 %v552_v61 }
 0x481   :  { %693 = vmatmul.mubr.msk.bf16.vlgmr.msra.gmra.mrb[8].mxu1 %vm218_vm3, %v86_v63 }
 0x554   :  { %v591_v1 = vpop.f32.mrb[8].mxu1 }
 0x555   :  { %v592_v2 = vadd.f32 %v591_v1, %v553_v0  ;;  %v694_v3 = vpop.f32.mrb[9].mxu1 }
 0x556   :  { %v594_v4 = vpop.f32.mrb[10].mxu1 }
 0x557   :  { %v597_v5 = vsub.f32 0.0, %v592_v2  ;;  %v695_v6 = vpop.f32.mrb[11].mxu1 }
 0x559   :  { %v598_v7 = vmul.f32 1.442695, %v597_v5 }
 0x55b   :  { %712 = vpow2.f32 %v598_v7 }
 0x565   :  { %v713_v8 = vpop.eup %712 }
 0x566   :  { %v600_v9 = vadd.f32 1.0, %v713_v8 }
 0x568   :  { %714 = vrcp.f32 %v600_v9 }
 0x572   :  { %v715_v10 = vpop.eup %714 }
 0x573   :  { %602 = vst [vmem:[%s916_s13] sm:$0x1] %v715_v10 }

</bundles_post_ra>
